<compile_context>
chip_gen: v7x
topology: tpu7x:2x2x1
jax: 0.10.0
libtpu: 0.0.40
codegen_flags: <defaults>
</compile_context>

<pallas_src>
import functools

import jax
import jax.numpy as jnp
from jax import lax
from jax.experimental import pallas as pl
from jax.experimental.pallas import tpu as pltpu

EPS = 1e-5  # nn.BatchNorm2d default eps


# ----------------------------------------------------------------------------
# Kernel
# ----------------------------------------------------------------------------
def _residual_block_kernel(x_ref, s_ref, p_ref,
                           wb1_ref, cb1_ref, g1_ref, be1_ref,
                           wb2_ref, cb2_ref, g2_ref, be2_ref,
                           o_ref, *, inv_count):
    """Fused Conv3x3 -> BN -> ReLU -> Conv3x3 -> BN -> +residual -> ReLU.

    x_ref   : (N*H, W*C)    input activation, lane-dense 2-D layout
    s_ref   : (3, N*H, N*H) per-image row-shift operators (kh taps, H border)
    p_ref   : (W*C, W*C)    channel-group spreading matrix for BN stats
    wb*_ref : (3, W*C, W*C) block-banded conv operators (kw taps + Cin->Cout)
    cb*_ref : (1, W*C)      conv bias, pre-tiled over W
    g*_ref  : (1, W*C)      BN gamma, pre-tiled over W
    be*_ref : (1, W*C)      BN beta,  pre-tiled over W
    o_ref   : (N*H, W*C)    output
    """
    x = x_ref[...]                                        # (NH, WC) f32

    def conv3x3(inp, wb_ref, cb_ref):
        # No explicit zero accumulator: start from the kh == 0 term.
        sh = jnp.dot(s_ref[0], inp, preferred_element_type=jnp.float32)
        acc = jnp.dot(sh, wb_ref[0], preferred_element_type=jnp.float32)
        for kh in (1, 2):
            sh = jnp.dot(s_ref[kh], inp, preferred_element_type=jnp.float32)
            acc = acc + jnp.dot(sh, wb_ref[kh],
                                preferred_element_type=jnp.float32)
        return acc + cb_ref[...]                          # conv bias

    def batchnorm(y, gamma_ref, beta_ref):
        # Single fused stats pass: per-channel sum / sum-of-squares, spread
        # back to every lane of that channel by P, reduced over rows.
        s1 = jnp.sum(jnp.dot(y, p_ref[...],
                             preferred_element_type=jnp.float32),
                     axis=0, keepdims=True)               # (1, WC)
        s2 = jnp.sum(jnp.dot(y * y, p_ref[...],
                             preferred_element_type=jnp.float32),
                     axis=0, keepdims=True)               # (1, WC)
        mean = s1 * inv_count
        var = s2 * inv_count - mean * mean                # biased variance
        scale = gamma_ref[...] * lax.rsqrt(var + EPS)     # rsqrt -> EUP
        shift = beta_ref[...] - mean * scale
        return y * scale + shift                          # one elementwise pass

    h = jnp.maximum(
        batchnorm(conv3x3(x, wb1_ref, cb1_ref), g1_ref, be1_ref), 0.0)
    h = batchnorm(conv3x3(h, wb2_ref, cb2_ref), g2_ref, be2_ref)
    o_ref[...] = jnp.maximum(h + x, 0.0)                  # residual + ReLU


# ----------------------------------------------------------------------------
# Operator builders (tiny, weight/shape-only preprocessing in the wrapper)
# ----------------------------------------------------------------------------
def _h_shift_operators(n, h):
    """(3, N*H, N*H): S[kh][(n,ho),(n',hi)] = 1 iff n'==n and hi==ho+kh-1."""
    r = jnp.arange(n * h)
    img = r // h
    row = r % h
    same = img[:, None] == img[None, :]
    mats = [same & (row[None, :] == row[:, None] + (kh - 1)) for kh in range(3)]
    return jnp.stack(mats).astype(jnp.float32)


def _banded_conv_operators(w, width):
    """w: (3, 3, Cin, Cout) -> (3, W*Cin, W*Cout) block-banded operators.

    Wb[kh, wi*C+ci, wo*C+co] = w[kh, wi-wo+1, ci, co] if 0 <= wi-wo+1 < 3 else 0
    (the zeros implement the padding=1 behaviour at the W borders).
    """
    _, _, cin, cout = w.shape
    wi = jnp.arange(width)[:, None]
    wo = jnp.arange(width)[None, :]
    kw = wi - wo + 1                                      # (W, W)
    valid = ((kw >= 0) & (kw < 3)).astype(w.dtype)
    band = w[:, jnp.clip(kw, 0, 2), :, :]                 # (3, W, W, Cin, Cout)
    band = band * valid[None, :, :, None, None]
    band = jnp.transpose(band, (0, 1, 3, 2, 4))           # (3, W, Cin, W, Cout)
    return band.reshape(3, width * cin, width * cout)


def _channel_spread_operator(width, c):
    """(W*C, W*C): P[l', l] = 1 iff l' % C == l % C (per-channel grouping)."""
    lane = jnp.arange(width * c)
    return (lane[:, None] % c == lane[None, :] % c).astype(jnp.float32)


def _tile_channels(v, width):
    """(1, C) per-channel vector -> (1, W*C) lane-layout-matched vector."""
    return jnp.tile(v.reshape(1, -1), (1, width))


# ----------------------------------------------------------------------------
# Wrappers
# ----------------------------------------------------------------------------
def residual_block_nhwc(x_nhwc, params):
    """x_nhwc: (N, H, W, C) float32 -> (N, H, W, C) float32."""
    n, h, w, c = x_nhwc.shape
    x2d = x_nhwc.astype(jnp.float32).reshape(n * h, w * c)   # free reshape

    s_ops = _h_shift_operators(n, h)
    p_op = _channel_spread_operator(w, c)
    wb1 = _banded_conv_operators(params["w1"].astype(jnp.float32), w)
    wb2 = _banded_conv_operators(params["w2"].astype(jnp.float32), w)
    cb1 = _tile_channels(params["b1"], w)
    cb2 = _tile_channels(params["b2"], w)
    g1 = _tile_channels(params["g1"], w)
    g2 = _tile_channels(params["g2"], w)
    be1 = _tile_channels(params["beta1"], w)
    be2 = _tile_channels(params["beta2"], w)

    vmem = pl.BlockSpec(memory_space=pltpu.MemorySpace.VMEM)
    kernel = functools.partial(_residual_block_kernel,
                               inv_count=1.0 / float(n * h * w))

    out2d = pl.pallas_call(
        kernel,
        out_shape=jax.ShapeDtypeStruct((n * h, w * c), jnp.float32),
        in_specs=[vmem] * 11,
        out_specs=vmem,
        compiler_params=pltpu.CompilerParams(
            vmem_limit_bytes=32 * 1024 * 1024),
    )(x2d, s_ops, p_op, wb1, cb1, g1, be1, wb2, cb2, g2, be2)

    return out2d.reshape(n, h, w, c)


@jax.jit
def residual_block(x_nchw, params):
    """PyTorch-layout entry: (N, C, H, W) -> (N, C, H, W).

    The NCHW<->NHWC transposes exist only for PyTorch interface parity; a
    model that carries NHWC should call residual_block_nhwc directly.
    """
    x_nhwc = jnp.transpose(x_nchw, (0, 2, 3, 1))
    out = residual_block_nhwc(x_nhwc, params)
    return jnp.transpose(out, (0, 3, 1, 2))


# ---------------- pure-JAX reference (for correctness check) ----------------
def reference_residual_block(x, p):
    def conv(x, w, b):
        w_oihw = jnp.transpose(w, (3, 2, 0, 1))  # (kh,kw,ci,co) -> (co,ci,kh,kw)
        y = lax.conv_general_dilated(
            x, w_oihw, window_strides=(1, 1), padding=((1, 1), (1, 1)),
            dimension_numbers=("NCHW", "OIHW", "NCHW"))
        return y + b.reshape(1, -1, 1, 1)

    def bn(x, g, be):
        mean = jnp.mean(x, axis=(0, 2, 3), keepdims=True)
        var = jnp.mean((x - mean) ** 2, axis=(0, 2, 3), keepdims=True)
        return ((x - mean) * lax.rsqrt(var + EPS)
                * g.reshape(1, -1, 1, 1) + be.reshape(1, -1, 1, 1))

    out = jnp.maximum(bn(conv(x, p["w1"], p["b1"]), p["g1"], p["beta1"]), 0.0)
    out = bn(conv(out, p["w2"], p["b2"]), p["g2"], p["beta2"])
    return jnp.maximum(out + x, 0.0)


def make_params(key, c):
    ks = jax.random.split(key, 8)
    scale = 1.0 / jnp.sqrt(9.0 * c)  # ~kaiming-ish fan-in scale for 3x3 conv
    return {
        "w1": (jax.random.normal(ks[0], (3, 3, c, c), jnp.float32) * scale),
        "b1": (jax.random.normal(ks[1], (1, c), jnp.float32) * 0.1),
        "g1": 1.0 + 0.1 * jax.random.normal(ks[2], (1, c), jnp.float32),
        "beta1": 0.1 * jax.random.normal(ks[3], (1, c), jnp.float32),
        "w2": (jax.random.normal(ks[4], (3, 3, c, c), jnp.float32) * scale),
        "b2": (jax.random.normal(ks[5], (1, c), jnp.float32) * 0.1),
        "g2": 1.0 + 0.1 * jax.random.normal(ks[6], (1, c), jnp.float32),
        "beta2": 0.1 * jax.random.normal(ks[7], (1, c), jnp.float32),
    }


if __name__ == "__main__":
    key = jax.random.PRNGKey(0)
    k_x, k_p = jax.random.split(key)

    N, C, H, W = 2, 4, 16, 16
    x = jax.random.normal(k_x, (N, C, H, W), jnp.float32)
    params = make_params(k_p, C)

    out = jax.block_until_ready(residual_block(x, params))
    ref = jax.block_until_ready(reference_residual_block(x, params))

    assert out.shape == (N, C, H, W)
    assert jnp.allclose(out, ref, rtol=2e-4, atol=2e-4), (
        f"max abs err = {jnp.max(jnp.abs(out - ref))}")

    print("KERNEL_OK")
</pallas_src>

<mosaic_0001>
module attributes {stable_mosaic.version = 11 : i64} {
  func.func @_residual_block_kernel(%arg0: memref<32x64xf32, #tpu.memory_space<vmem>>, %arg1: memref<3x32x32xf32, #tpu.memory_space<vmem>>, %arg2: memref<64x64xf32, #tpu.memory_space<vmem>>, %arg3: memref<3x64x64xf32, #tpu.memory_space<vmem>>, %arg4: memref<1x64xf32, #tpu.memory_space<vmem>>, %arg5: memref<1x64xf32, #tpu.memory_space<vmem>>, %arg6: memref<1x64xf32, #tpu.memory_space<vmem>>, %arg7: memref<3x64x64xf32, #tpu.memory_space<vmem>>, %arg8: memref<1x64xf32, #tpu.memory_space<vmem>>, %arg9: memref<1x64xf32, #tpu.memory_space<vmem>>, %arg10: memref<1x64xf32, #tpu.memory_space<vmem>>, %arg11: memref<32x64xf32, #tpu.memory_space<vmem>>) attributes {dimension_semantics = [], scalar_prefetch = 0 : i64, scratch_operands = 0 : i64, tpu.core_type = #tpu.core_type<tc>} {
    %c0 = arith.constant 0 : index
    %c0_0 = arith.constant 0 : index
    %0 = vector.load %arg0[%c0, %c0_0] : memref<32x64xf32, #tpu.memory_space<vmem>>, vector<32x64xf32>
    %c0_1 = arith.constant 0 : index
    %c0_2 = arith.constant 0 : index
    %c0_3 = arith.constant 0 : index
    %1 = vector.load %arg1[%c0_1, %c0_2, %c0_3] : memref<3x32x32xf32, #tpu.memory_space<vmem>>, vector<1x32x32xf32>
    %2 = vector.shape_cast %1 : vector<1x32x32xf32> to vector<32x32xf32>
    %cst = arith.constant dense<0.000000e+00> : vector<32x64xf32>
    %3 = tpu.matmul %2, %0, %cst {dimension_numbers = #tpu.dot_dimension_numbers<[1], [0], [0], [1], [0, 0, 1, 1], [], []>} : vector<32x32xf32>, vector<32x64xf32>, vector<32x64xf32> -> vector<32x64xf32>
    %c0_4 = arith.constant 0 : index
    %c0_5 = arith.constant 0 : index
    %c0_6 = arith.constant 0 : index
    %4 = vector.load %arg3[%c0_4, %c0_5, %c0_6] : memref<3x64x64xf32, #tpu.memory_space<vmem>>, vector<1x64x64xf32>
    %5 = vector.shape_cast %4 : vector<1x64x64xf32> to vector<64x64xf32>
    %cst_7 = arith.constant dense<0.000000e+00> : vector<32x64xf32>
    %6 = tpu.matmul %3, %5, %cst_7 {dimension_numbers = #tpu.dot_dimension_numbers<[1], [0], [0], [1], [0, 0, 1, 1], [], []>} : vector<32x64xf32>, vector<64x64xf32>, vector<32x64xf32> -> vector<32x64xf32>
    %c1 = arith.constant 1 : index
    %c0_8 = arith.constant 0 : index
    %c0_9 = arith.constant 0 : index
    %7 = vector.load %arg1[%c1, %c0_8, %c0_9] : memref<3x32x32xf32, #tpu.memory_space<vmem>>, vector<1x32x32xf32>
    %8 = vector.shape_cast %7 : vector<1x32x32xf32> to vector<32x32xf32>
    %cst_10 = arith.constant dense<0.000000e+00> : vector<32x64xf32>
    %9 = tpu.matmul %8, %0, %cst_10 {dimension_numbers = #tpu.dot_dimension_numbers<[1], [0], [0], [1], [0, 0, 1, 1], [], []>} : vector<32x32xf32>, vector<32x64xf32>, vector<32x64xf32> -> vector<32x64xf32>
    %c1_11 = arith.constant 1 : index
    %c0_12 = arith.constant 0 : index
    %c0_13 = arith.constant 0 : index
    %10 = vector.load %arg3[%c1_11, %c0_12, %c0_13] : memref<3x64x64xf32, #tpu.memory_space<vmem>>, vector<1x64x64xf32>
    %11 = vector.shape_cast %10 : vector<1x64x64xf32> to vector<64x64xf32>
    %cst_14 = arith.constant dense<0.000000e+00> : vector<32x64xf32>
    %12 = tpu.matmul %9, %11, %cst_14 {dimension_numbers = #tpu.dot_dimension_numbers<[1], [0], [0], [1], [0, 0, 1, 1], [], []>} : vector<32x64xf32>, vector<64x64xf32>, vector<32x64xf32> -> vector<32x64xf32>
    %13 = arith.addf %6, %12 : vector<32x64xf32>
    %c2 = arith.constant 2 : index
    %c0_15 = arith.constant 0 : index
    %c0_16 = arith.constant 0 : index
    %14 = vector.load %arg1[%c2, %c0_15, %c0_16] : memref<3x32x32xf32, #tpu.memory_space<vmem>>, vector<1x32x32xf32>
    %15 = vector.shape_cast %14 : vector<1x32x32xf32> to vector<32x32xf32>
    %cst_17 = arith.constant dense<0.000000e+00> : vector<32x64xf32>
    %16 = tpu.matmul %15, %0, %cst_17 {dimension_numbers = #tpu.dot_dimension_numbers<[1], [0], [0], [1], [0, 0, 1, 1], [], []>} : vector<32x32xf32>, vector<32x64xf32>, vector<32x64xf32> -> vector<32x64xf32>
    %c2_18 = arith.constant 2 : index
    %c0_19 = arith.constant 0 : index
    %c0_20 = arith.constant 0 : index
    %17 = vector.load %arg3[%c2_18, %c0_19, %c0_20] : memref<3x64x64xf32, #tpu.memory_space<vmem>>, vector<1x64x64xf32>
    %18 = vector.shape_cast %17 : vector<1x64x64xf32> to vector<64x64xf32>
    %cst_21 = arith.constant dense<0.000000e+00> : vector<32x64xf32>
    %19 = tpu.matmul %16, %18, %cst_21 {dimension_numbers = #tpu.dot_dimension_numbers<[1], [0], [0], [1], [0, 0, 1, 1], [], []>} : vector<32x64xf32>, vector<64x64xf32>, vector<32x64xf32> -> vector<32x64xf32>
    %20 = arith.addf %13, %19 : vector<32x64xf32>
    %c0_22 = arith.constant 0 : index
    %c0_23 = arith.constant 0 : index
    %21 = vector.load %arg4[%c0_22, %c0_23] : memref<1x64xf32, #tpu.memory_space<vmem>>, vector<1x64xf32>
    %22 = vector.broadcast %21 : vector<1x64xf32> to vector<32x64xf32>
    %23 = arith.addf %20, %22 : vector<32x64xf32>
    %c0_24 = arith.constant 0 : index
    %c0_25 = arith.constant 0 : index
    %24 = vector.load %arg2[%c0_24, %c0_25] : memref<64x64xf32, #tpu.memory_space<vmem>>, vector<64x64xf32>
    %cst_26 = arith.constant dense<0.000000e+00> : vector<32x64xf32>
    %25 = tpu.matmul %23, %24, %cst_26 {dimension_numbers = #tpu.dot_dimension_numbers<[1], [0], [0], [1], [0, 0, 1, 1], [], []>} : vector<32x64xf32>, vector<64x64xf32>, vector<32x64xf32> -> vector<32x64xf32>
    %cst_27 = arith.constant dense<0.000000e+00> : vector<64xf32>
    %26 = vector.multi_reduction <add>, %25, %cst_27 [0] : vector<32x64xf32> to vector<64xf32>
    %27 = vector.shape_cast %26 : vector<64xf32> to vector<1x64xf32>
    %28 = arith.mulf %23, %23 : vector<32x64xf32>
    %c0_28 = arith.constant 0 : index
    %c0_29 = arith.constant 0 : index
    %29 = vector.load %arg2[%c0_28, %c0_29] : memref<64x64xf32, #tpu.memory_space<vmem>>, vector<64x64xf32>
    %cst_30 = arith.constant dense<0.000000e+00> : vector<32x64xf32>
    %30 = tpu.matmul %28, %29, %cst_30 {dimension_numbers = #tpu.dot_dimension_numbers<[1], [0], [0], [1], [0, 0, 1, 1], [], []>} : vector<32x64xf32>, vector<64x64xf32>, vector<32x64xf32> -> vector<32x64xf32>
    %cst_31 = arith.constant dense<0.000000e+00> : vector<64xf32>
    %31 = vector.multi_reduction <add>, %30, %cst_31 [0] : vector<32x64xf32> to vector<64xf32>
    %32 = vector.shape_cast %31 : vector<64xf32> to vector<1x64xf32>
    %cst_32 = arith.constant 0.001953125 : f32
    %33 = vector.broadcast %cst_32 : f32 to vector<1x64xf32>
    %34 = arith.mulf %27, %33 : vector<1x64xf32>
    %cst_33 = arith.constant 0.001953125 : f32
    %35 = vector.broadcast %cst_33 : f32 to vector<1x64xf32>
    %36 = arith.mulf %32, %35 : vector<1x64xf32>
    %37 = arith.mulf %34, %34 : vector<1x64xf32>
    %38 = arith.subf %36, %37 : vector<1x64xf32>
    %c0_34 = arith.constant 0 : index
    %c0_35 = arith.constant 0 : index
    %39 = vector.load %arg5[%c0_34, %c0_35] : memref<1x64xf32, #tpu.memory_space<vmem>>, vector<1x64xf32>
    %cst_36 = arith.constant 9.99999974E-6 : f32
    %40 = vector.broadcast %cst_36 : f32 to vector<1x64xf32>
    %41 = arith.addf %38, %40 : vector<1x64xf32>
    %42 = math.rsqrt %41 : vector<1x64xf32>
    %43 = arith.mulf %39, %42 : vector<1x64xf32>
    %c0_37 = arith.constant 0 : index
    %c0_38 = arith.constant 0 : index
    %44 = vector.load %arg6[%c0_37, %c0_38] : memref<1x64xf32, #tpu.memory_space<vmem>>, vector<1x64xf32>
    %45 = arith.mulf %34, %43 : vector<1x64xf32>
    %46 = arith.subf %44, %45 : vector<1x64xf32>
    %47 = vector.broadcast %43 : vector<1x64xf32> to vector<32x64xf32>
    %48 = arith.mulf %23, %47 : vector<32x64xf32>
    %49 = vector.broadcast %46 : vector<1x64xf32> to vector<32x64xf32>
    %50 = arith.addf %48, %49 : vector<32x64xf32>
    %cst_39 = arith.constant 0.000000e+00 : f32
    %51 = vector.broadcast %cst_39 : f32 to vector<32x64xf32>
    %52 = arith.maximumf %50, %51 : vector<32x64xf32>
    %c0_40 = arith.constant 0 : index
    %c0_41 = arith.constant 0 : index
    %c0_42 = arith.constant 0 : index
    %53 = vector.load %arg1[%c0_40, %c0_41, %c0_42] : memref<3x32x32xf32, #tpu.memory_space<vmem>>, vector<1x32x32xf32>
    %54 = vector.shape_cast %53 : vector<1x32x32xf32> to vector<32x32xf32>
    %cst_43 = arith.constant dense<0.000000e+00> : vector<32x64xf32>
    %55 = tpu.matmul %54, %52, %cst_43 {dimension_numbers = #tpu.dot_dimension_numbers<[1], [0], [0], [1], [0, 0, 1, 1], [], []>} : vector<32x32xf32>, vector<32x64xf32>, vector<32x64xf32> -> vector<32x64xf32>
    %c0_44 = arith.constant 0 : index
    %c0_45 = arith.constant 0 : index
    %c0_46 = arith.constant 0 : index
    %56 = vector.load %arg7[%c0_44, %c0_45, %c0_46] : memref<3x64x64xf32, #tpu.memory_space<vmem>>, vector<1x64x64xf32>
    %57 = vector.shape_cast %56 : vector<1x64x64xf32> to vector<64x64xf32>
    %cst_47 = arith.constant dense<0.000000e+00> : vector<32x64xf32>
    %58 = tpu.matmul %55, %57, %cst_47 {dimension_numbers = #tpu.dot_dimension_numbers<[1], [0], [0], [1], [0, 0, 1, 1], [], []>} : vector<32x64xf32>, vector<64x64xf32>, vector<32x64xf32> -> vector<32x64xf32>
    %c1_48 = arith.constant 1 : index
    %c0_49 = arith.constant 0 : index
    %c0_50 = arith.constant 0 : index
    %59 = vector.load %arg1[%c1_48, %c0_49, %c0_50] : memref<3x32x32xf32, #tpu.memory_space<vmem>>, vector<1x32x32xf32>
    %60 = vector.shape_cast %59 : vector<1x32x32xf32> to vector<32x32xf32>
    %cst_51 = arith.constant dense<0.000000e+00> : vector<32x64xf32>
    %61 = tpu.matmul %60, %52, %cst_51 {dimension_numbers = #tpu.dot_dimension_numbers<[1], [0], [0], [1], [0, 0, 1, 1], [], []>} : vector<32x32xf32>, vector<32x64xf32>, vector<32x64xf32> -> vector<32x64xf32>
    %c1_52 = arith.constant 1 : index
    %c0_53 = arith.constant 0 : index
    %c0_54 = arith.constant 0 : index
    %62 = vector.load %arg7[%c1_52, %c0_53, %c0_54] : memref<3x64x64xf32, #tpu.memory_space<vmem>>, vector<1x64x64xf32>
    %63 = vector.shape_cast %62 : vector<1x64x64xf32> to vector<64x64xf32>
    %cst_55 = arith.constant dense<0.000000e+00> : vector<32x64xf32>
    %64 = tpu.matmul %61, %63, %cst_55 {dimension_numbers = #tpu.dot_dimension_numbers<[1], [0], [0], [1], [0, 0, 1, 1], [], []>} : vector<32x64xf32>, vector<64x64xf32>, vector<32x64xf32> -> vector<32x64xf32>
    %65 = arith.addf %58, %64 : vector<32x64xf32>
    %c2_56 = arith.constant 2 : index
    %c0_57 = arith.constant 0 : index
    %c0_58 = arith.constant 0 : index
    %66 = vector.load %arg1[%c2_56, %c0_57, %c0_58] : memref<3x32x32xf32, #tpu.memory_space<vmem>>, vector<1x32x32xf32>
    %67 = vector.shape_cast %66 : vector<1x32x32xf32> to vector<32x32xf32>
    %cst_59 = arith.constant dense<0.000000e+00> : vector<32x64xf32>
    %68 = tpu.matmul %67, %52, %cst_59 {dimension_numbers = #tpu.dot_dimension_numbers<[1], [0], [0], [1], [0, 0, 1, 1], [], []>} : vector<32x32xf32>, vector<32x64xf32>, vector<32x64xf32> -> vector<32x64xf32>
    %c2_60 = arith.constant 2 : index
    %c0_61 = arith.constant 0 : index
    %c0_62 = arith.constant 0 : index
    %69 = vector.load %arg7[%c2_60, %c0_61, %c0_62] : memref<3x64x64xf32, #tpu.memory_space<vmem>>, vector<1x64x64xf32>
    %70 = vector.shape_cast %69 : vector<1x64x64xf32> to vector<64x64xf32>
    %cst_63 = arith.constant dense<0.000000e+00> : vector<32x64xf32>
    %71 = tpu.matmul %68, %70, %cst_63 {dimension_numbers = #tpu.dot_dimension_numbers<[1], [0], [0], [1], [0, 0, 1, 1], [], []>} : vector<32x64xf32>, vector<64x64xf32>, vector<32x64xf32> -> vector<32x64xf32>
    %72 = arith.addf %65, %71 : vector<32x64xf32>
    %c0_64 = arith.constant 0 : index
    %c0_65 = arith.constant 0 : index
    %73 = vector.load %arg8[%c0_64, %c0_65] : memref<1x64xf32, #tpu.memory_space<vmem>>, vector<1x64xf32>
    %74 = vector.broadcast %73 : vector<1x64xf32> to vector<32x64xf32>
    %75 = arith.addf %72, %74 : vector<32x64xf32>
    %c0_66 = arith.constant 0 : index
    %c0_67 = arith.constant 0 : index
    %76 = vector.load %arg2[%c0_66, %c0_67] : memref<64x64xf32, #tpu.memory_space<vmem>>, vector<64x64xf32>
    %cst_68 = arith.constant dense<0.000000e+00> : vector<32x64xf32>
    %77 = tpu.matmul %75, %76, %cst_68 {dimension_numbers = #tpu.dot_dimension_numbers<[1], [0], [0], [1], [0, 0, 1, 1], [], []>} : vector<32x64xf32>, vector<64x64xf32>, vector<32x64xf32> -> vector<32x64xf32>
    %cst_69 = arith.constant dense<0.000000e+00> : vector<64xf32>
    %78 = vector.multi_reduction <add>, %77, %cst_69 [0] : vector<32x64xf32> to vector<64xf32>
    %79 = vector.shape_cast %78 : vector<64xf32> to vector<1x64xf32>
    %80 = arith.mulf %75, %75 : vector<32x64xf32>
    %c0_70 = arith.constant 0 : index
    %c0_71 = arith.constant 0 : index
    %81 = vector.load %arg2[%c0_70, %c0_71] : memref<64x64xf32, #tpu.memory_space<vmem>>, vector<64x64xf32>
    %cst_72 = arith.constant dense<0.000000e+00> : vector<32x64xf32>
    %82 = tpu.matmul %80, %81, %cst_72 {dimension_numbers = #tpu.dot_dimension_numbers<[1], [0], [0], [1], [0, 0, 1, 1], [], []>} : vector<32x64xf32>, vector<64x64xf32>, vector<32x64xf32> -> vector<32x64xf32>
    %cst_73 = arith.constant dense<0.000000e+00> : vector<64xf32>
    %83 = vector.multi_reduction <add>, %82, %cst_73 [0] : vector<32x64xf32> to vector<64xf32>
    %84 = vector.shape_cast %83 : vector<64xf32> to vector<1x64xf32>
    %cst_74 = arith.constant 0.001953125 : f32
    %85 = vector.broadcast %cst_74 : f32 to vector<1x64xf32>
    %86 = arith.mulf %79, %85 : vector<1x64xf32>
    %cst_75 = arith.constant 0.001953125 : f32
    %87 = vector.broadcast %cst_75 : f32 to vector<1x64xf32>
    %88 = arith.mulf %84, %87 : vector<1x64xf32>
    %89 = arith.mulf %86, %86 : vector<1x64xf32>
    %90 = arith.subf %88, %89 : vector<1x64xf32>
    %c0_76 = arith.constant 0 : index
    %c0_77 = arith.constant 0 : index
    %91 = vector.load %arg9[%c0_76, %c0_77] : memref<1x64xf32, #tpu.memory_space<vmem>>, vector<1x64xf32>
    %cst_78 = arith.constant 9.99999974E-6 : f32
    %92 = vector.broadcast %cst_78 : f32 to vector<1x64xf32>
    %93 = arith.addf %90, %92 : vector<1x64xf32>
    %94 = math.rsqrt %93 : vector<1x64xf32>
    %95 = arith.mulf %91, %94 : vector<1x64xf32>
    %c0_79 = arith.constant 0 : index
    %c0_80 = arith.constant 0 : index
    %96 = vector.load %arg10[%c0_79, %c0_80] : memref<1x64xf32, #tpu.memory_space<vmem>>, vector<1x64xf32>
    %97 = arith.mulf %86, %95 : vector<1x64xf32>
    %98 = arith.subf %96, %97 : vector<1x64xf32>
    %99 = vector.broadcast %95 : vector<1x64xf32> to vector<32x64xf32>
    %100 = arith.mulf %75, %99 : vector<32x64xf32>
    %101 = vector.broadcast %98 : vector<1x64xf32> to vector<32x64xf32>
    %102 = arith.addf %100, %101 : vector<32x64xf32>
    %103 = arith.addf %102, %0 : vector<32x64xf32>
    %cst_81 = arith.constant 0.000000e+00 : f32
    %104 = vector.broadcast %cst_81 : f32 to vector<32x64xf32>
    %105 = arith.maximumf %103, %104 : vector<32x64xf32>
    %c0_82 = arith.constant 0 : index
    %c0_83 = arith.constant 0 : index
    %106 = vector.load %arg11[%c0_82, %c0_83] : memref<32x64xf32, #tpu.memory_space<vmem>>, vector<32x64xf32>
    tpu.vector_store %arg11[%c0_82, %c0_83], %105 {strides = array<i32>} : memref<32x64xf32, #tpu.memory_space<vmem>>, vector<32x64xf32>,
    return
  }
}

</mosaic_0001>

<bundles_post_ra>
// kernel: residual_block.1
= control target key start
LH: loop header
LB: loop body
LE: loop exit
PB: predicated region body
PF: predicated region fallthrough
CT: control target
= control target key end

     0   :  { %vm46_vm0 = vcmask 261120   ;;  %vm263_vm1 = vcmask 523264   ;;  %s3160_s0 = inlined_call_operand.vmem [shape: f32[32,64], index: 0, kind: input, shape index: {}]   ;;  %s3161_s1 = inlined_call_operand.vmem [shape: f32[3,32,32], index: 1, kind: input, shape index: {}]   ;;  %s3162_s3 = inlined_call_operand.vmem [shape: f32[3,64,64], index: 3, kind: input, shape index: {}]   ;;  %s3163_s2 = inlined_call_operand.vmem [shape: f32[64,64], index: 2, kind: input, shape index: {}]   ;;  %s3164_s4 = inlined_call_operand.vmem [shape: f32[1,64], index: 4, kind: input, shape index: {}]   ;;  %s3165_s5 = inlined_call_operand.vmem [shape: f32[1,64], index: 5, kind: input, shape index: {}]   ;;  %s3166_s6 = inlined_call_operand.vmem [shape: f32[1,64], index: 6, kind: input, shape index: {}]   ;;  %s3167_s7 = inlined_call_operand.vmem [shape: f32[3,64,64], index: 7, kind: input, shape index: {}]   ;;  %s3168_s8 = inlined_call_operand.vmem [shape: f32[1,64], index: 8, kind: input, shape index: {}]   ;;  %s3169_s9 = inlined_call_operand.vmem [shape: f32[1,64], index: 9, kind: input, shape index: {}]   ;;  %s3170_s10 = inlined_call_operand.vmem [shape: f32[1,64], index: 10, kind: input, shape index: {}]   ;;  %s3171_s11 = inlined_call_operand.vmem [shape: f32[32,64], index: 11, kind: output, shape index: {}]  }
   0x1   :  { %v2675_v0 = vld [vmem:[%s3160_s0] sm:$0xff]  ;;  %v2680_v1 = vld [vmem:[%s3160_s0 + $0x8] sm:$0xff]  ;;  %v2685_v2 = vld [vmem:[%s3160_s0 + $0x10] sm:$0xff] }
   0x2   :  { %v2384_v3 = vpack.c.bf16 %v2680_v1, %v2675_v0  ;;  %v2692_v4 = vld [vmem:[%s3160_s0 + $0x18] sm:$0xff]  ;;  %v2697_v5 = vld [vmem:[%s3161_s1 + $0x20] sm:$0xff]  ;;  %v1819_v9 = vld [vmem:[%s3162_s3 + $0x48] sm:$0xff] }
   0x3   :  { %v2388_v6 = vpack.c.bf16 %v2692_v4, %v2685_v2  ;;  %2102 = vmatprep.mubr.msk.f32.mxu1 %vm46_vm0, %v2697_v5  ;;  %v2706_v7 = vld [vmem:[%s3161_s1] sm:$0xff]  ;;  %v2719_v11 = vld [vmem:[%s3161_s1 + $0x28] sm:$0xff]  ;;  %v2729_v13 = vld [vmem:[%s3161_s1 + $0x30] sm:$0xff] }
   0x4   :  { %2393 = vmatprep.subr.bf16.mxu1 %v2384_v3  ;;  %2385 = vmatprep.subr.bf16.mxu0 %v2384_v3  ;;  %v1818_v8 = vld [vmem:[%s3162_s3 + $0x40] sm:$0xff]  ;;  %v2724_v12 = vld [vmem:[%s3161_s1 + $0x8] sm:$0xff]  ;;  %v2734_v14 = vld [vmem:[%s3161_s1 + $0x10] sm:$0xff] }
   0x5   :  { %2395 = vmatpush3.bf16.msra.mxu1 %v2384_v3  ;;  %2387 = vmatpush3.bf16.msra.mxu0 %v2384_v3  ;;  %v2400_v10 = vpack.c.bf16 %v1819_v9, %v1818_v8  ;;  %v1820_v15 = vld [vmem:[%s3162_s3 + $0x50] sm:$0xff]  ;;  %v1821_v16 = vld [vmem:[%s3162_s3 + $0x58] sm:$0xff]  ;;  %v1822_v19 = vld [vmem:[%s3162_s3 + $0x60] sm:$0xff] }
   0x6   :  { %2397 = vmatprep.subr.bf16.mxu1 %v2388_v6  ;;  %2389 = vmatprep.subr.bf16.mxu0 %v2388_v6  ;;  %v2747_v17 = vld [vmem:[%s3161_s1 + $0x38] sm:$0xff]  ;;  %v1823_v20 = vld [vmem:[%s3162_s3 + $0x68] sm:$0xff]  ;;  %v2769_v21 = vld [vmem:[%s3161_s1 + $0x40] sm:$0xff]  ;;  %v2404_v22 = vpack.c.bf16 %v1821_v16, %v1820_v15 }
   0x7   :  { %2088 = vmatprep.mubr.msk.f32.mxu0 %vm46_vm0, %v2706_v7  ;;  %v2756_v18 = vld [vmem:[%s3161_s1 + $0x18] sm:$0xff]  ;;  %v2408_v23 = vpack.c.bf16 %v1823_v20, %v1822_v19  ;;  %v2780_v24 = vld [vmem:[%s3161_s1 + $0x48] sm:$0xff]  ;;  %v1824_v25 = vld [vmem:[%s3162_s3 + $0x70] sm:$0xff] }
   0x8   :  { %v1825_v26 = vld [vmem:[%s3162_s3 + $0x78] sm:$0xff]  ;;  %v2791_v27 = vld [vmem:[%s3161_s1 + $0x50] sm:$0xff]  ;;  %v144_v30 = vld [vmem:[%s3162_s3] sm:$0xff] }
   0x9   :  { %2399 = vmatpush3.bf16.msra.mxu1 %v2388_v6  ;;  %2391 = vmatpush3.bf16.msra.mxu0 %v2388_v6  ;;  %v2412_v28 = vpack.c.bf16 %v1825_v26, %v1824_v25  ;;  %v2800_v29 = vld [vmem:[%s3161_s1 + $0x58] sm:$0xff]  ;;  %v145_v31 = vld [vmem:[%s3162_s3 + $0x8] sm:$0xff]  ;;  %v681_v33 = vld [vmem:[%s3163_s2] sm:$0xff] }
   0xa   :  { %2433 = vmatprep.subr.bf16.mxu1 %v2384_v3  ;;  %2401 = vmatprep.subr.bf16.mxu0 %v2400_v10  ;;  %v2416_v32 = vpack.c.bf16 %v145_v31, %v144_v30  ;;  %v682_v34 = vld [vmem:[%s3163_s2 + $0x8] sm:$0xff]  ;;  %v683_v35 = vld [vmem:[%s3163_s2 + $0x10] sm:$0xff]  ;;  %v684_v37 = vld [vmem:[%s3163_s2 + $0x18] sm:$0xff] }
   0xb   :  { %v2819_v36 = vpack.c.bf16 %v682_v34, %v681_v33  ;;  %v2824_v38 = vpack.c.bf16 %v684_v37, %v683_v35  ;;  %v685_v39 = vld [vmem:[%s3163_s2 + $0x20] sm:$0xff]  ;;  %v686_v40 = vld [vmem:[%s3163_s2 + $0x28] sm:$0xff]  ;;  %v146_v42 = vld [vmem:[%s3162_s3 + $0x10] sm:$0xff] }
   0xc   :  { %2103 = vmatmul.mubr.msk.f32.vlgmr.msra.gmra.mrb[0].mxu1 %vm46_vm0, %v2719_v11  ;;  %2089 = vmatmul.mubr.msk.f32.vlgmr.msra.gmra.mrb[0].mxu0 %vm46_vm0, %v2724_v12  ;;  %v2835_v41 = vpack.c.bf16 %v686_v40, %v685_v39  ;;  %v147_v43 = vld [vmem:[%s3162_s3 + $0x18] sm:$0xff]  ;;  %v148_v49 = vld [vmem:[%s3162_s3 + $0x20] sm:$0xff]  ;;  %v149_v50 = vld [vmem:[%s3162_s3 + $0x28] sm:$0xff] }
   0xd   :  { %2105 = vmatprep.mubr.msk.f32.mxu1 %vm46_vm0, %v2729_v13  ;;  %2435 = vmatpush3.bf16.msra.mxu1 %v2384_v3  ;;  %v2420_v47 = vpack.c.bf16 %v147_v43, %v146_v42  ;;  %v2424_v53 = vpack.c.bf16 %v149_v50, %v148_v49  ;;  %v150_v56 = vld [vmem:[%s3162_s3 + $0x30] sm:$0xff]  ;;  %v151_v57 = vld [vmem:[%s3162_s3 + $0x38] sm:$0xff]  ;;  %v1842_v61 = vld [vmem:[%s3162_s3 + $0x80] sm:$0xff] }
   0xe   :  { %2091 = vmatprep.mubr.msk.f32.mxu0 %vm46_vm0, %v2734_v14  ;;  %2437 = vmatprep.subr.bf16.mxu1 %v2388_v6  ;;  %v2428_v59 = vpack.c.bf16 %v151_v57, %v150_v56  ;;  %v1843_v62 = vld [vmem:[%s3162_s3 + $0x88] sm:$0xff]  ;;  %v1844_v8 = vld [vmem:[%s3162_s3 + $0x90] sm:$0xff]  ;;  %v1845_v9 = vld [vmem:[%s3162_s3 + $0x98] sm:$0xff] }
   0xf   :  { %2403 = vmatpush3.bf16.msra.mxu0 %v2400_v10  ;;  %v2440_v3 = vpack.c.bf16 %v1843_v62, %v1842_v61  ;;  %v2444_v10 = vpack.c.bf16 %v1845_v9, %v1844_v8  ;;  %v1846_v15 = vld [vmem:[%s3162_s3 + $0xa0] sm:$0xff]  ;;  %v1847_v16 = vld [vmem:[%s3162_s3 + $0xa8] sm:$0xff]  ;;  %v1848_v20 = vld [vmem:[%s3162_s3 + $0xb0] sm:$0xff] }
  0x10   :  { %2106 = vmatmul.mubr.msk.f32.gmra.mrb[2].mxu1 %vm46_vm0, %v2747_v17  ;;  %2092 = vmatmul.mubr.msk.f32.gmra.mrb[2].mxu0 %vm46_vm0, %v2756_v18  ;;  %v2448_v19 = vpack.c.bf16 %v1847_v16, %v1846_v15  ;;  %v687_v25 = vld [vmem:[%s3163_s2 + $0x30] sm:$0xff]  ;;  %v688_v26 = vld [vmem:[%s3163_s2 + $0x38] sm:$0xff] }
  0x11   :  { %2439 = vmatpush3.bf16.msra.mxu1 %v2388_v6  ;;  %2160 = vmatprep.mubr.msk.f32.mxu1 %vm46_vm0, %v2769_v21 }
  0x12   :  { %2405 = vmatprep.subr.bf16.mxu0 %v2404_v22  ;;  %2457 = vmatprep.subr.bf16.mxu1 %v2819_v36 }
  0x13   :  { %2407 = vmatpush3.bf16.msra.mxu0 %v2404_v22  ;;  %v1849_v22 = vld [vmem:[%s3162_s3 + $0xb8] sm:$0xff] }
  0x14   :  { %2161 = vmatmul.mubr.msk.f32.vlgmr.msra.gmra.mrb[4].mxu1 %vm46_vm0, %v2780_v24  ;;  %2409 = vmatprep.subr.bf16.mxu0 %v2408_v23 }
  0x15   :  { %2163 = vmatprep.mubr.msk.f32.mxu1 %vm46_vm0, %v2791_v27  ;;  %2459 = vmatpush3.bf16.msra.mxu1 %v2819_v36 }
  0x16   :  { %2461 = vmatprep.subr.bf16.mxu1 %v2824_v38 }
  0x17   :  { %2411 = vmatpush3.bf16.msra.mxu0 %v2408_v23  ;;  %v2452_v23 = vpack.c.bf16 %v1849_v22, %v1848_v20 }
  0x18   :  { %2164 = vmatmul.mubr.msk.f32.gmra.mrb[6].mxu1 %vm46_vm0, %v2800_v29  ;;  %2413 = vmatprep.subr.bf16.mxu0 %v2412_v28 }
  0x19   :  { %2463 = vmatpush3.bf16.msra.mxu1 %v2824_v38 }
  0x1a   :  { %2465 = vmatprep.subr.bf16.mxu1 %v2835_v41 }
  0x1b   :  { %2415 = vmatpush3.bf16.msra.mxu0 %v2412_v28  ;;  %v2902_v28 = vpack.c.bf16 %v688_v26, %v687_v25 }
  0x1c   :  { %2417 = vmatprep.subr.bf16.mxu0 %v2416_v32 }
  0x1d   :  { %2467 = vmatpush3.bf16.msra.mxu1 %v2835_v41 }
  0x1e   :  { %2469 = vmatprep.subr.bf16.mxu1 %v2902_v28 }
  0x21   :  { %2471 = vmatpush3.bf16.msra.mxu1 %v2902_v28 }
  0x22   :  { %2473 = vmatprep.subr.bf16.mxu1 %v2819_v36 }
  0xdf   :  { %v2104_v44 = vpop.f32.mrb[0].mxu1  ;;  %v2090_v45 = vpop.f32.mrb[0].mxu0 }
  0xe0   :  { %v235_v46 = vpop.f32.mrb[1].mxu1  ;;  %v125_v48 = vpop.f32.mrb[1].mxu0 }
  0xe1   :  { %2124 = vmatprep.mubr.msk.f32.mxu0 %vm263_vm1, %v235_v46 }
  0xe2   :  { %2125 = vmatmul.mubr.msk.f32.vlgmr.msra.gmra.mrb[4].mxu0 %vm263_vm1, %v2104_v44 }
  0xe3   :  { %2419 = vmatpush3.bf16.msra.mxu0 %v2416_v32  ;;  %v2107_v51 = vpop.f32.mrb[2].mxu1  ;;  %v2093_v52 = vpop.f32.mrb[2].mxu0 }
  0xe4   :  { %2421 = vmatprep.subr.bf16.mxu0 %v2420_v47  ;;  %v245_v54 = vpop.f32.mrb[3].mxu1  ;;  %v135_v55 = vpop.f32.mrb[3].mxu0 }
  0xe5   :  { %2127 = vmatprep.mubr.msk.f32.mxu0 %vm263_vm1, %v245_v54 }
  0xe6   :  { %2128 = vmatmul.mubr.msk.f32.gmra.mrb[6].mxu0 %vm263_vm1, %v2107_v51 }
  0xe7   :  { %2423 = vmatpush3.bf16.msra.mxu0 %v2420_v47  ;;  %2146 = vmatprep.mubr.msk.f32.mxu0 %vm263_vm1, %v125_v48  ;;  %v2162_v58 = vpop.f32.mrb[4].mxu1 }
  0xe8   :  { %2425 = vmatprep.subr.bf16.mxu0 %v2424_v53  ;;  %v541_v60 = vpop.f32.mrb[5].mxu1 }
  0xeb   :  { %2427 = vmatpush3.bf16.msra.mxu0 %v2424_v53  ;;  %v2165_v63 = vpop.f32.mrb[6].mxu1 }
  0xec   :  { %2429 = vmatprep.subr.bf16.mxu0 %v2428_v59  ;;  %v551_v6 = vpop.f32.mrb[7].mxu1 }
  0xef   :  { %2431 = vmatpush3.bf16.msra.mxu0 %v2428_v59 }
  0xf0   :  { %2441 = vmatprep.subr.bf16.mxu0 %v2440_v3 }
  0xf2   :  { %2147 = vmatmul.mubr.msk.f32.vlgmr.msra.gmra.mrb[4].mxu0 %vm263_vm1, %v2090_v45 }
  0xf3   :  { %2443 = vmatpush3.bf16.msra.mxu0 %v2440_v3  ;;  %2149 = vmatprep.mubr.msk.f32.mxu0 %vm263_vm1, %v135_v55 }
  0xf4   :  { %2445 = vmatprep.subr.bf16.mxu0 %v2444_v10 }
  0xf6   :  { %2150 = vmatmul.mubr.msk.f32.gmra.mrb[6].mxu0 %vm263_vm1, %v2093_v52 }
  0xf7   :  { %2447 = vmatpush3.bf16.msra.mxu0 %v2444_v10  ;;  %2182 = vmatprep.mubr.msk.f32.mxu0 %vm263_vm1, %v541_v60 }
  0xf8   :  { %2449 = vmatprep.subr.bf16.mxu0 %v2448_v19 }
  0xfb   :  { %2451 = vmatpush3.bf16.msra.mxu0 %v2448_v19 }
  0xfc   :  { %2453 = vmatprep.subr.bf16.mxu0 %v2452_v23 }
  0xff   :  { %2455 = vmatpush3.bf16.msra.mxu0 %v2452_v23 }
 0x102   :  { %2183 = vmatmul.mubr.msk.f32.vlgmr.msra.gmra.mrb[4].mxu0 %vm263_vm1, %v2162_v58 }
 0x103   :  { %2185 = vmatprep.mubr.msk.f32.mxu0 %vm263_vm1, %v551_v6 }
 0x106   :  { %2186 = vmatmul.mubr.msk.f32.gmra.mrb[6].mxu0 %vm263_vm1, %v2165_v63 }
 0x107   :  { %2254 = vmatprep.mubr.msk.f32.mxu0 %vm46_vm0, %v2697_v5  ;;  %v1854_v5 = vld [vmem:[%s3164_s4] ss:$0 sm:$0xff] }
 0x1d5   :  { %v2184_v30 = vpop.f32.mrb[4].mxu0 }
 0x1d6   :  { %v647_v31 = vpop.f32.mrb[5].mxu0  ;;  %v2912_v33 = vadd.f32 %v2184_v30, %v1854_v5 }
 0x1d7   :  { %v2910_v32 = vadd.f32 %v1854_v5, %v647_v31 }
 0x1d8   :  { %v800_v42 = vmul.f32 %v2912_v33, %v2912_v33 }
 0x1d9   :  { %v2187_v34 = vpop.f32.mrb[6].mxu0  ;;  %2204 = vmatprep.mubr.msk.f32.mxu1 %vm263_vm1, %v2910_v32  ;;  %v799_v40 = vmul.f32 %v2910_v32, %v2910_v32 }
 0x1da   :  { %v657_v35 = vpop.f32.mrb[7].mxu0  ;;  %2205 = vmatmul.mubr.msk.f32.vlgmr.msra.gmra.mrb[8].mxu1 %vm263_vm1, %v2912_v33  ;;  %v2921_v39 = vadd.f32 %v2187_v34, %v1854_v5 }
 0x1db   :  { %v2918_v37 = vadd.f32 %v1854_v5, %v657_v35  ;;  %2475 = vmatpush3.bf16.msra.mxu1 %v2819_v36 }
 0x1dc   :  { %2477 = vmatprep.subr.bf16.mxu1 %v2824_v38  ;;  %v802_v44 = vmul.f32 %v2921_v39, %v2921_v39 }
 0x1dd   :  { %2207 = vmatprep.mubr.msk.f32.mxu1 %vm263_vm1, %v2918_v37  ;;  %v801_v43 = vmul.f32 %v2918_v37, %v2918_v37 }
 0x1de   :  { %2208 = vmatmul.mubr.msk.f32.gmra.mrb[10].mxu1 %vm263_vm1, %v2921_v39 }
 0x1df   :  { %2479 = vmatpush3.bf16.msra.mxu1 %v2824_v38  ;;  %2226 = vmatprep.mubr.msk.f32.mxu1 %vm263_vm1, %v799_v40 }
 0x1e0   :  { %2481 = vmatprep.subr.bf16.mxu1 %v2835_v41 }
 0x1e3   :  { %2483 = vmatpush3.bf16.msra.mxu1 %v2835_v41 }
 0x1e4   :  { %2485 = vmatprep.subr.bf16.mxu1 %v2902_v28 }
 0x1e7   :  { %2487 = vmatpush3.bf16.msra.mxu1 %v2902_v28 }
 0x1ea   :  { %2227 = vmatmul.mubr.msk.f32.vlgmr.msra.gmra.mrb[12].mxu1 %vm263_vm1, %v800_v42  ;;  %v925_v42 = vlaneseq }
 0x1eb   :  { %2229 = vmatprep.mubr.msk.f32.mxu1 %vm263_vm1, %v801_v43 }
 0x1ec   :  { %v926_v43 = vshrl.u32 %v925_v42, 7 }
 0x1ee   :  { %2230 = vmatmul.mubr.msk.f32.gmra.mrb[14].mxu1 %vm263_vm1, %v802_v44  ;;  %v917_v44 = vld [vmem:[%s3165_s5] sm:$0x1] }
 0x1ef   :  { %2240 = vmatprep.mubr.msk.f32.mxu1 %vm46_vm0, %v2706_v7 }
 0x2ad   :  { %v2206_v45 = vpop.f32.mrb[8].mxu1 }
 0x2ae   :  { %v787_v46 = vsel %vm263_vm1, %v2206_v45, 0.0  ;;  %v767_v47 = vpop.f32.mrb[9].mxu1  ;;  %v2958_v45 = vsub.s32 0, %v926_v43 }
 0x2af   :  { %v786_v48 = vsel %vm263_vm1, %v767_v47, 0.0 }
 0x2b0   :  { %v788_v49 = vadd.f32 %v787_v46, %v786_v48  ;;  %v921_v48 = vld [vmem:[%s3166_s6] sm:$0x1] }
 0x2b1   :  { %v2209_v50 = vpop.f32.mrb[10].mxu1 }
 0x2b2   :  { %v777_v51 = vpop.f32.mrb[11].mxu1  ;;  %v791_v54 = vsel %vm263_vm1, %v2209_v50, 0.0 }
 0x2b3   :  { %v789_v52 = vsel %vm263_vm1, %v777_v51, 0.0 }
 0x2b4   :  { %v790_v53 = vadd.f32 %v789_v52, %v788_v49 }
 0x2b6   :  { %v792_v55 = vadd.f32 %v791_v54, %v790_v53 }
 0x2b8   :  { %v793_v56 = vrot.slane %v792_v55, 4 }
 0x2ba   :  { %v794_v57 = vadd.f32 %v793_v56, %v792_v55 }
 0x2bc   :  { %v795_v61 = vrot.slane %v794_v57, 2 }
 0x2bd   :  { %v2228_v58 = vpop.f32.mrb[12].mxu1 }
 0x2be   :  { %v901_v7 = vsel %vm263_vm1, %v2228_v58, 0.0  ;;  %v881_v59 = vpop.f32.mrb[13].mxu1  ;;  %v796_v8 = vadd.f32 %v795_v61, %v794_v57 }
 0x2bf   :  { %v900_v60 = vsel %vm263_vm1, %v881_v59, 0.0 }
 0x2c0   :  { %v902_v62 = vadd.f32 %v901_v7, %v900_v60  ;;  %v797_v16 = vrot.slane %v796_v8, 1 }
 0x2c1   :  { %v2231_v63 = vpop.f32.mrb[14].mxu1 }
 0x2c2   :  { %v891_v3 = vpop.f32.mrb[15].mxu1  ;;  %v905_v10 = vsel %vm263_vm1, %v2231_v63, 0.0  ;;  %v798_v22 = vadd.f32 %v797_v16, %v796_v8  ;;  %v1874_v8 = vld [vmem:[%s3167_s7 + $0x58] sm:$0xff] }
 0x2c3   :  { %v903_v6 = vsel %vm263_vm1, %v891_v3, 0.0 }
 0x2c4   :  { %v904_v9 = vadd.f32 %v903_v6, %v902_v62  ;;  %v913_v26 = vmul.f32 0.001953125, %v798_v22 }
 0x2c6   :  { %v906_v15 = vadd.f32 %v905_v10, %v904_v9  ;;  %v915_v31 = vmul.f32 %v913_v26, %v913_v26  ;;  %v1875_v9 = vld [vmem:[%s3167_s7 + $0x60] sm:$0xff]  ;;  %v1876_v10 = vld [vmem:[%s3167_s7 + $0x68] sm:$0xff] }
 0x2c8   :  { %v907_v19 = vrot.slane %v906_v15, 4 }
 0x2ca   :  { %v908_v20 = vadd.f32 %v907_v19, %v906_v15 }
 0x2cc   :  { %v909_v23 = vrot.slane %v908_v20, 2 }
 0x2ce   :  { %v910_v25 = vadd.f32 %v909_v23, %v908_v20  ;;  %v1037_v23 = vld [vmem:[%s3167_s7 + $0x20] sm:$0xff] }
 0x2d0   :  { %v911_v5 = vrot.slane %v910_v25, 1 }
 0x2d2   :  { %v912_v30 = vadd.f32 %v911_v5, %v910_v25  ;;  %v1038_v25 = vld [vmem:[%s3167_s7 + $0x28] sm:$0xff] }
 0x2d4   :  { %v914_v34 = vmul.f32 0.001953125, %v912_v30  ;;  %v2528_v30 = vpack.c.bf16 %v1038_v25, %v1037_v23 }
 0x2d6   :  { %v916_v35 = vsub.f32 %v914_v34, %v915_v31 }
 0x2d8   :  { %v918_v40 = vadd.f32 1e-05, %v916_v35  ;;  %v1039_v35 = vld [vmem:[%s3167_s7 + $0x30] sm:$0xff] }
 0x2da   :  { %2608 = vrsqrt.f32 %v918_v40  ;;  %v1040_v40 = vld [vmem:[%s3167_s7 + $0x38] sm:$0xff] }
 0x2db   :  { %v2532_v43 = vpack.c.bf16 %v1040_v40, %v1039_v35 }
 0x2e4   :  { %v2609_v46 = vpop.eup %2608 }
 0x2e5   :  { %v920_v47 = vmul.f32 %v2609_v46, %v917_v44  ;;  %v1891_v46 = vld [vmem:[%s3167_s7 + $0x80] sm:$0xff] }
 0x2e7   :  { %v922_v49 = vmul.f32 %v920_v47, %v913_v26  ;;  %v928_v50 = vrot.slane %v920_v47, %v2958_v45  ;;  %v1892_v47 = vld [vmem:[%s3167_s7 + $0x88] sm:$0xff] }
 0x2e9   :  { %v923_v51 = vsub.f32 %v921_v48, %v922_v49  ;;  %v930_v52 = vmul.f32 %v928_v50, %v2910_v32  ;;  %v931_v53 = vmul.f32 %v928_v50, %v2912_v33  ;;  %v932_v55 = vmul.f32 %v928_v50, %v2918_v37  ;;  %v1871_v32 = vld [vmem:[%s3167_s7 + $0x40] sm:$0xff]  ;;  %v1872_v33 = vld [vmem:[%s3167_s7 + $0x48] sm:$0xff] }
 0x2ea   :  { %v933_v56 = vmul.f32 %v928_v50, %v2921_v39  ;;  %v2504_v37 = vpack.c.bf16 %v1872_v33, %v1871_v32  ;;  %v1873_v39 = vld [vmem:[%s3167_s7 + $0x50] sm:$0xff]  ;;  %v2544_v49 = vpack.c.bf16 %v1892_v47, %v1891_v46 }
 0x2eb   :  { %v938_v54 = vrot.slane %v923_v51, %v2958_v45  ;;  %v1893_v51 = vld [vmem:[%s3167_s7 + $0x90] sm:$0xff] }
 0x2ed   :  { %v940_v57 = vadd.f32 %v938_v54, %v930_v52  ;;  %v941_v58 = vadd.f32 %v938_v54, %v931_v53  ;;  %v942_v7 = vadd.f32 %v938_v54, %v932_v55  ;;  %v943_v59 = vadd.f32 %v938_v54, %v933_v56  ;;  %v1894_v52 = vld [vmem:[%s3167_s7 + $0x98] sm:$0xff]  ;;  %v1895_v54 = vld [vmem:[%s3167_s7 + $0xa0] sm:$0xff]  ;;  %v1896_v55 = vld [vmem:[%s3167_s7 + $0xa8] sm:$0xff] }
 0x2ee   :  { %v2548_v53 = vpack.c.bf16 %v1894_v52, %v1893_v51  ;;  %v2552_v56 = vpack.c.bf16 %v1896_v55, %v1895_v54 }
 0x2ef   :  { %v944_v60 = vmax.f32 %v940_v57, 0.0  ;;  %v945_v61 = vmax.f32 %v941_v58, 0.0  ;;  %v946_v62 = vmax.f32 %v942_v7, 0.0  ;;  %v947_v63 = vmax.f32 %v943_v59, 0.0  ;;  %v1897_v57 = vld [vmem:[%s3167_s7 + $0xb0] sm:$0xff]  ;;  %v1898_v58 = vld [vmem:[%s3167_s7 + $0xb8] sm:$0xff] }
 0x2f0   :  { %v2556_v7 = vpack.c.bf16 %v1898_v58, %v1897_v57  ;;  %v1903_v59 = vld [vmem:[%s3168_s8] ss:$0 sm:$0xff] }
 0x2f1   :  { %v2488_v3 = vpack.c.bf16 %v945_v61, %v944_v60  ;;  %v2492_v6 = vpack.c.bf16 %v947_v63, %v946_v62 }
 0x2f3   :  { %2489 = vmatprep.subr.bf16.mxu1 %v2488_v3  ;;  %2497 = vmatprep.subr.bf16.mxu0 %v2488_v3 }
 0x2f4   :  { %2491 = vmatpush3.bf16.msra.mxu1 %v2488_v3  ;;  %2499 = vmatpush3.bf16.msra.mxu0 %v2488_v3 }
 0x2f5   :  { %2493 = vmatprep.subr.bf16.mxu1 %v2492_v6  ;;  %2501 = vmatprep.subr.bf16.mxu0 %v2492_v6 }
 0x2f8   :  { %2495 = vmatpush3.bf16.msra.mxu1 %v2492_v6  ;;  %2503 = vmatpush3.bf16.msra.mxu0 %v2492_v6 }
 0x2f9   :  { %2537 = vmatprep.subr.bf16.mxu0 %v2488_v3  ;;  %2505 = vmatprep.subr.bf16.mxu1 %v2504_v37 }
 0x2fb   :  { %2255 = vmatmul.mubr.msk.f32.vlgmr.msra.gmra.mrb[8].mxu0 %vm46_vm0, %v2719_v11  ;;  %2241 = vmatmul.mubr.msk.f32.vlgmr.msra.gmra.mrb[16].mxu1 %vm46_vm0, %v2724_v12  ;;  %v2508_v11 = vpack.c.bf16 %v1874_v8, %v1873_v39  ;;  %v2512_v12 = vpack.c.bf16 %v1876_v10, %v1875_v9 }
 0x2fc   :  { %2539 = vmatpush3.bf16.msra.mxu0 %v2488_v3  ;;  %2257 = vmatprep.mubr.msk.f32.mxu0 %vm46_vm0, %v2729_v13  ;;  %v1877_v13 = vld [vmem:[%s3167_s7 + $0x70] sm:$0xff] }
 0x2fd   :  { %2541 = vmatprep.subr.bf16.mxu0 %v2492_v6  ;;  %2243 = vmatprep.mubr.msk.f32.mxu1 %vm46_vm0, %v2734_v14  ;;  %v1878_v14 = vld [vmem:[%s3167_s7 + $0x78] sm:$0xff] }
 0x2fe   :  { %2507 = vmatpush3.bf16.msra.mxu1 %v2504_v37 }
 0x2ff   :  { %2258 = vmatmul.mubr.msk.f32.gmra.mrb[10].mxu0 %vm46_vm0, %v2747_v17  ;;  %2244 = vmatmul.mubr.msk.f32.gmra.mrb[18].mxu1 %vm46_vm0, %v2756_v18  ;;  %v2516_v17 = vpack.c.bf16 %v1878_v14, %v1877_v13  ;;  %v1033_v18 = vld [vmem:[%s3167_s7] sm:$0xff] }
 0x300   :  { %2543 = vmatpush3.bf16.msra.mxu0 %v2492_v6  ;;  %2312 = vmatprep.mubr.msk.f32.mxu0 %vm46_vm0, %v2769_v21  ;;  %v1034_v21 = vld [vmem:[%s3167_s7 + $0x8] sm:$0xff] }
 0x301   :  { %2509 = vmatprep.subr.bf16.mxu1 %v2508_v11  ;;  %2561 = vmatprep.subr.bf16.mxu0 %v2819_v36 }
 0x302   :  { %2511 = vmatpush3.bf16.msra.mxu1 %v2508_v11 }
 0x303   :  { %2313 = vmatmul.mubr.msk.f32.vlgmr.msra.gmra.mrb[12].mxu0 %vm46_vm0, %v2780_v24  ;;  %2513 = vmatprep.subr.bf16.mxu1 %v2512_v12  ;;  %v2520_v24 = vpack.c.bf16 %v1034_v21, %v1033_v18 }
 0x304   :  { %2315 = vmatprep.mubr.msk.f32.mxu0 %vm46_vm0, %v2791_v27  ;;  %2563 = vmatpush3.bf16.msra.mxu0 %v2819_v36  ;;  %v1035_v27 = vld [vmem:[%s3167_s7 + $0x10] sm:$0xff] }
 0x305   :  { %2565 = vmatprep.subr.bf16.mxu0 %v2824_v38 }
 0x306   :  { %2515 = vmatpush3.bf16.msra.mxu1 %v2512_v12 }
 0x307   :  { %2316 = vmatmul.mubr.msk.f32.gmra.mrb[14].mxu0 %vm46_vm0, %v2800_v29  ;;  %2517 = vmatprep.subr.bf16.mxu1 %v2516_v17  ;;  %v1036_v29 = vld [vmem:[%s3167_s7 + $0x18] sm:$0xff] }
 0x308   :  { %2567 = vmatpush3.bf16.msra.mxu0 %v2824_v38  ;;  %v2524_v20 = vpack.c.bf16 %v1036_v29, %v1035_v27 }
 0x309   :  { %2569 = vmatprep.subr.bf16.mxu0 %v2835_v41 }
 0x30a   :  { %2519 = vmatpush3.bf16.msra.mxu1 %v2516_v17 }
 0x30b   :  { %2521 = vmatprep.subr.bf16.mxu1 %v2520_v24 }
 0x30c   :  { %2571 = vmatpush3.bf16.msra.mxu0 %v2835_v41 }
 0x30d   :  { %2573 = vmatprep.subr.bf16.mxu0 %v2902_v28 }
 0x310   :  { %2575 = vmatpush3.bf16.msra.mxu0 %v2902_v28 }
 0x311   :  { %2577 = vmatprep.subr.bf16.mxu0 %v2819_v36 }
 0x3ce   :  { %v2256_v15 = vpop.f32.mrb[8].mxu0  ;;  %v2242_v16 = vpop.f32.mrb[16].mxu1 }
 0x3cf   :  { %v1107_v19 = vpop.f32.mrb[9].mxu0  ;;  %v1014_v22 = vpop.f32.mrb[17].mxu1 }
 0x3d0   :  { %2276 = vmatprep.mubr.msk.f32.mxu1 %vm263_vm1, %v1107_v19 }
 0x3d1   :  { %2277 = vmatmul.mubr.msk.f32.vlgmr.msra.gmra.mrb[20].mxu1 %vm263_vm1, %v2256_v15 }
 0x3d2   :  { %2523 = vmatpush3.bf16.msra.mxu1 %v2520_v24  ;;  %v2259_v26 = vpop.f32.mrb[10].mxu0  ;;  %v2245_v5 = vpop.f32.mrb[18].mxu1 }
 0x3d3   :  { %2525 = vmatprep.subr.bf16.mxu1 %v2524_v20  ;;  %v1117_v31 = vpop.f32.mrb[11].mxu0  ;;  %v1024_v34 = vpop.f32.mrb[19].mxu1 }
 0x3d4   :  { %2279 = vmatprep.mubr.msk.f32.mxu1 %vm263_vm1, %v1117_v31 }
 0x3d5   :  { %2280 = vmatmul.mubr.msk.f32.gmra.mrb[22].mxu1 %vm263_vm1, %v2259_v26 }
 0x3d6   :  { %2527 = vmatpush3.bf16.msra.mxu1 %v2524_v20  ;;  %2298 = vmatprep.mubr.msk.f32.mxu1 %vm263_vm1, %v1014_v22  ;;  %v2314_v42 = vpop.f32.mrb[12].mxu0 }
 0x3d7   :  { %2529 = vmatprep.subr.bf16.mxu1 %v2528_v30  ;;  %v1395_v44 = vpop.f32.mrb[13].mxu0 }
 0x3da   :  { %2531 = vmatpush3.bf16.msra.mxu1 %v2528_v30  ;;  %v2317_v48 = vpop.f32.mrb[14].mxu0 }
 0x3db   :  { %2533 = vmatprep.subr.bf16.mxu1 %v2532_v43  ;;  %v1405_v50 = vpop.f32.mrb[15].mxu0 }
 0x3de   :  { %2535 = vmatpush3.bf16.msra.mxu1 %v2532_v43 }
 0x3df   :  { %2545 = vmatprep.subr.bf16.mxu1 %v2544_v49 }
 0x3e1   :  { %2299 = vmatmul.mubr.msk.f32.vlgmr.msra.gmra.mrb[20].mxu1 %vm263_vm1, %v2242_v16 }
 0x3e2   :  { %2547 = vmatpush3.bf16.msra.mxu1 %v2544_v49  ;;  %2301 = vmatprep.mubr.msk.f32.mxu1 %vm263_vm1, %v1024_v34 }
 0x3e3   :  { %2549 = vmatprep.subr.bf16.mxu1 %v2548_v53 }
 0x3e5   :  { %2302 = vmatmul.mubr.msk.f32.gmra.mrb[22].mxu1 %vm263_vm1, %v2245_v5 }
 0x3e6   :  { %2551 = vmatpush3.bf16.msra.mxu1 %v2548_v53  ;;  %2334 = vmatprep.mubr.msk.f32.mxu1 %vm263_vm1, %v1395_v44  ;;  %v1763_v53 = vld [vmem:[%s3169_s9] sm:$0x1] }
 0x3e7   :  { %2553 = vmatprep.subr.bf16.mxu1 %v2552_v56 }
 0x3ea   :  { %2555 = vmatpush3.bf16.msra.mxu1 %v2552_v56  ;;  %v1767_v56 = vld [vmem:[%s3170_s10] sm:$0x1] }
 0x3eb   :  { %2557 = vmatprep.subr.bf16.mxu1 %v2556_v7 }
 0x3ee   :  { %2559 = vmatpush3.bf16.msra.mxu1 %v2556_v7 }
 0x3f1   :  { %2335 = vmatmul.mubr.msk.f32.vlgmr.msra.gmra.mrb[20].mxu1 %vm263_vm1, %v2314_v42 }
 0x3f2   :  { %2337 = vmatprep.mubr.msk.f32.mxu1 %vm263_vm1, %v1405_v50 }
 0x3f5   :  { %2338 = vmatmul.mubr.msk.f32.gmra.mrb[22].mxu1 %vm263_vm1, %v2317_v48 }
 0x4c4   :  { %v2336_v60 = vpop.f32.mrb[20].mxu1 }
 0x4c5   :  { %v1501_v61 = vpop.f32.mrb[21].mxu1  ;;  %v3087_v63 = vadd.f32 %v2336_v60, %v1903_v59 }
 0x4c6   :  { %v3085_v62 = vadd.f32 %v1903_v59, %v1501_v61 }
 0x4c8   :  { %v2339_v3 = vpop.f32.mrb[22].mxu1  ;;  %2356 = vmatprep.mubr.msk.f32.mxu0 %vm263_vm1, %v3085_v62  ;;  %v1645_v37 = vmul.f32 %v3085_v62, %v3085_v62 }
 0x4c9   :  { %v1511_v6 = vpop.f32.mrb[23].mxu1  ;;  %2357 = vmatmul.mubr.msk.f32.vlgmr.msra.gmra.mrb[16].mxu0 %vm263_vm1, %v3087_v63  ;;  %v3096_v33 = vadd.f32 %v2339_v3, %v1903_v59 }
 0x4ca   :  { %v3093_v32 = vadd.f32 %v1903_v59, %v1511_v6  ;;  %2579 = vmatpush3.bf16.msra.mxu0 %v2819_v36  ;;  %v1646_v36 = vmul.f32 %v3087_v63, %v3087_v63 }
 0x4cb   :  { %2581 = vmatprep.subr.bf16.mxu0 %v2824_v38 }
 0x4cc   :  { %2359 = vmatprep.mubr.msk.f32.mxu0 %vm263_vm1, %v3093_v32  ;;  %v1647_v39 = vmul.f32 %v3093_v32, %v3093_v32 }
 0x4cd   :  { %2360 = vmatmul.mubr.msk.f32.gmra.mrb[18].mxu0 %vm263_vm1, %v3096_v33 }
 0x4ce   :  { %2583 = vmatpush3.bf16.msra.mxu0 %v2824_v38  ;;  %2378 = vmatprep.mubr.msk.f32.mxu0 %vm263_vm1, %v1645_v37  ;;  %v1648_v38 = vmul.f32 %v3096_v33, %v3096_v33 }
 0x4cf   :  { %2585 = vmatprep.subr.bf16.mxu0 %v2835_v41 }
 0x4d2   :  { %2587 = vmatpush3.bf16.msra.mxu0 %v2835_v41 }
 0x4d3   :  { %2589 = vmatprep.subr.bf16.mxu0 %v2902_v28 }
 0x4d6   :  { %2591 = vmatpush3.bf16.msra.mxu0 %v2902_v28 }
 0x4d9   :  { %2379 = vmatmul.mubr.msk.f32.vlgmr.msra.gmra.mrb[20].mxu0 %vm263_vm1, %v1646_v36 }
 0x4da   :  { %2381 = vmatprep.mubr.msk.f32.mxu0 %vm263_vm1, %v1647_v39 }
 0x4dd   :  { %2382 = vmatmul.mubr.msk.f32.gmra.mrb[22].mxu0 %vm263_vm1, %v1648_v38 }
 0x59c   :  { %v2358_v41 = vpop.f32.mrb[16].mxu0 }
 0x59d   :  { %v1633_v8 = vsel %vm263_vm1, %v2358_v41, 0.0  ;;  %v1613_v9 = vpop.f32.mrb[17].mxu0 }
 0x59e   :  { %v1632_v28 = vsel %vm263_vm1, %v1613_v9, 0.0 }
 0x59f   :  { %v1634_v10 = vadd.f32 %v1633_v8, %v1632_v28 }
 0x5a0   :  { %v2361_v11 = vpop.f32.mrb[18].mxu0 }
 0x5a1   :  { %v1623_v12 = vpop.f32.mrb[19].mxu0  ;;  %v1637_v17 = vsel %vm263_vm1, %v2361_v11, 0.0 }
 0x5a2   :  { %v1635_v13 = vsel %vm263_vm1, %v1623_v12, 0.0 }
 0x5a3   :  { %v1636_v14 = vadd.f32 %v1635_v13, %v1634_v10 }
 0x5a5   :  { %v1638_v18 = vadd.f32 %v1637_v17, %v1636_v14 }
 0x5a7   :  { %v1639_v21 = vrot.slane %v1638_v18, 4 }
 0x5a9   :  { %v1640_v24 = vadd.f32 %v1639_v21, %v1638_v18 }
 0x5ab   :  { %v1641_v19 = vrot.slane %v1640_v24, 2 }
 0x5ac   :  { %v2380_v27 = vpop.f32.mrb[20].mxu0 }
 0x5ad   :  { %v1747_v29 = vsel %vm263_vm1, %v2380_v27, 0.0  ;;  %v1727_v15 = vpop.f32.mrb[21].mxu0  ;;  %v1642_v26 = vadd.f32 %v1641_v19, %v1640_v24 }
 0x5ae   :  { %v1746_v16 = vsel %vm263_vm1, %v1727_v15, 0.0 }
 0x5af   :  { %v1748_v20 = vadd.f32 %v1747_v29, %v1746_v16  ;;  %v1643_v34 = vrot.slane %v1642_v26, 1 }
 0x5b0   :  { %v2383_v22 = vpop.f32.mrb[22].mxu0 }
 0x5b1   :  { %v1737_v23 = vpop.f32.mrb[23].mxu0  ;;  %v1751_v30 = vsel %vm263_vm1, %v2383_v22, 0.0  ;;  %v1644_v42 = vadd.f32 %v1643_v34, %v1642_v26 }
 0x5b2   :  { %v1749_v25 = vsel %vm263_vm1, %v1737_v23, 0.0 }
 0x5b3   :  { %v1750_v5 = vadd.f32 %v1749_v25, %v1748_v20  ;;  %v1759_v46 = vmul.f32 0.001953125, %v1644_v42 }
 0x5b5   :  { %v1752_v31 = vadd.f32 %v1751_v30, %v1750_v5  ;;  %v1761_v49 = vmul.f32 %v1759_v46, %v1759_v46 }
 0x5b7   :  { %v1753_v35 = vrot.slane %v1752_v31, 4 }
 0x5b9   :  { %v1754_v40 = vadd.f32 %v1753_v35, %v1752_v31 }
 0x5bb   :  { %v1755_v43 = vrot.slane %v1754_v40, 2 }
 0x5bd   :  { %v1756_v44 = vadd.f32 %v1755_v43, %v1754_v40 }
 0x5bf   :  { %v1757_v47 = vrot.slane %v1756_v44, 1 }
 0x5c1   :  { %v1758_v48 = vadd.f32 %v1757_v47, %v1756_v44 }
 0x5c3   :  { %v1760_v50 = vmul.f32 0.001953125, %v1758_v48 }
 0x5c5   :  { %v1762_v51 = vsub.f32 %v1760_v50, %v1761_v49 }
 0x5c7   :  { %v1764_v52 = vadd.f32 1e-05, %v1762_v51 }
 0x5c9   :  { %2610 = vrsqrt.f32 %v1764_v52 }
 0x5d3   :  { %v2611_v54 = vpop.eup %2610 }
 0x5d4   :  { %v1766_v55 = vmul.f32 %v2611_v54, %v1763_v53 }
 0x5d6   :  { %v1768_v57 = vmul.f32 %v1766_v55, %v1759_v46  ;;  %v1774_v58 = vrot.slane %v1766_v55, %v2958_v45 }
 0x5d8   :  { %v1769_v7 = vsub.f32 %v1767_v56, %v1768_v57  ;;  %v1776_v59 = vmul.f32 %v1774_v58, %v3085_v62  ;;  %v1777_v60 = vmul.f32 %v1774_v58, %v3087_v63  ;;  %v1778_v61 = vmul.f32 %v1774_v58, %v3093_v32 }
 0x5d9   :  { %v1779_v3 = vmul.f32 %v1774_v58, %v3096_v33 }
 0x5da   :  { %v1784_v6 = vrot.slane %v1769_v7, %v2958_v45 }
 0x5dc   :  { %v1786_v37 = vadd.f32 %v1784_v6, %v1776_v59  ;;  %v1787_v36 = vadd.f32 %v1784_v6, %v1777_v60  ;;  %v1788_v39 = vadd.f32 %v1784_v6, %v1778_v61  ;;  %v1789_v38 = vadd.f32 %v1784_v6, %v1779_v3 }
 0x5de   :  { %v1790_v41 = vadd.f32 %v1786_v37, %v2675_v0  ;;  %v1791_v8 = vadd.f32 %v1787_v36, %v2680_v1  ;;  %v1792_v9 = vadd.f32 %v1788_v39, %v2685_v2  ;;  %v1793_v62 = vadd.f32 %v1789_v38, %v2692_v4 }
 0x5e0   :  { %v1794_v28 = vmax.f32 %v1790_v41, 0.0  ;;  %v1795_v63 = vmax.f32 %v1791_v8, 0.0  ;;  %v1796_v10 = vmax.f32 %v1792_v9, 0.0  ;;  %v1797_v32 = vmax.f32 %v1793_v62, 0.0 }
 0x5e2   :  { %1798 = vst.msk [vmem:[%s3171_s11] sm:$0xff] %vm263_vm1, %v1794_v28  ;;  %1799 = vst.msk [vmem:[%s3171_s11 + $0x8] sm:$0xff] %vm263_vm1, %v1795_v63 }
 0x5e3   :  { %1800 = vst.msk [vmem:[%s3171_s11 + $0x10] sm:$0xff] %vm263_vm1, %v1796_v10  ;;  %1801 = vst.msk [vmem:[%s3171_s11 + $0x18] sm:$0xff] %vm263_vm1, %v1797_v32 }

</bundles_post_ra>
